<compile_context>
chip_gen: v6e
topology: v6e:2x2x1
jax: 0.10.0
libtpu: 0.0.40
codegen_flags: <defaults>
</compile_context>

<pallas_src>
import functools

import jax
import jax.numpy as jnp
from jax.experimental import pallas as pl
from jax.experimental.pallas import tpu as pltpu


def _var_lstm_cell_kernel(xz_ref, nz_ref, w_ref, b_ref, cx_ref,
                          hy_ref, cy_ref, acc_ref, *, compute_dtype):
    ki = pl.program_id(2)

    @pl.when(ki == 0)
    def _():
        acc_ref[...] = jnp.zeros_like(acc_ref)

    # Noised, K-concatenated input:  z[g] = [x * noise_in[g], hx * noise_hidden[g]]
    z = (xz_ref[...][None, :, :] * nz_ref[...]).astype(compute_dtype)   # (4, tb, tk)
    w = w_ref[...].astype(compute_dtype)                                # (4, tk, tn)

    # One batched MXU matmul over the 4 gates, f32 accumulation.
    acc_ref[...] += jax.lax.dot_general(
        z, w,
        dimension_numbers=(((2,), (1,)), ((0,), (0,))),
        preferred_element_type=jnp.float32)                             # (4, tb, tn)

    @pl.when(ki == pl.num_programs(2) - 1)
    def _():
        b = b_ref[...].astype(jnp.float32)                              # (4, tn)
        # Consume gates as they are produced (i, c, f, o) to limit live f32 tiles.
        ingate = jax.nn.sigmoid(acc_ref[0] + b[0:1])
        cellgate = jnp.tanh(acc_ref[2] + b[2:3])
        ic = ingate * cellgate
        forgetgate = jax.nn.sigmoid(acc_ref[1] + b[1:2])
        cy = forgetgate * cx_ref[...].astype(jnp.float32) + ic
        outgate = jax.nn.sigmoid(acc_ref[3] + b[3:4])
        hy = outgate * jnp.tanh(cy)
        cy_ref[...] = cy.astype(cy_ref.dtype)
        hy_ref[...] = hy.astype(hy_ref.dtype)


def _pick_tile(dim, candidates):
    """Largest candidate tile that divides `dim`; else the full dim (always legal)."""
    for c in candidates:
        if dim >= c and dim % c == 0:
            return c
    return dim


def var_lstm_cell(x, hx, cx, w_ih, w_hh, b_ih=None, b_hh=None,
                  noise_in=None, noise_hidden=None,
                  compute_dtype=jnp.bfloat16):
    B, I = x.shape
    H = w_hh.shape[-1]
    K = I + H

    # ---- one-time layout changes (K-concat fusion + bias fold) -----------------
    w = jnp.concatenate([w_ih, w_hh], axis=1).astype(compute_dtype)     # (4, K, H)
    if b_ih is None:
        b = jnp.zeros((4, H), jnp.float32)
    else:
        b = (b_ih + b_hh).astype(jnp.float32)                           # (4, H)

    # eval-mode path of the module: noise is None -> identity noise
    if noise_in is None:
        noise_in = jnp.ones((4, B, I), x.dtype)
    if noise_hidden is None:
        noise_hidden = jnp.ones((4, B, H), x.dtype)

    xz = jnp.concatenate([x, hx], axis=-1)                              # (B, K)
    nz = jnp.concatenate([noise_in, noise_hidden], axis=-1)             # (4, B, K)

    # ---- tiling: lane/sublane aligned tiles, or full-dim fallback for small shapes.
    # (For best perf choose H as a multiple of 128; small H falls back to masked stores.)
    tb = _pick_tile(B, (256, 128, 64, 32, 16, 8))
    tn = _pick_tile(H, (256, 128))
    tk = _pick_tile(K, (512, 256, 128))
    grid = (B // tb, H // tn, K // tk)

    kernel = functools.partial(_var_lstm_cell_kernel, compute_dtype=compute_dtype)

    hy, cy = pl.pallas_call(
        kernel,
        out_shape=(jax.ShapeDtypeStruct((B, H), x.dtype),
                   jax.ShapeDtypeStruct((B, H), x.dtype)),
        grid_spec=pltpu.PrefetchScalarGridSpec(
            num_scalar_prefetch=0,
            grid=grid,
            in_specs=[
                pl.BlockSpec((tb, tk), lambda bi, ni, ki: (bi, ki)),        # xz
                pl.BlockSpec((4, tb, tk), lambda bi, ni, ki: (0, bi, ki)),  # nz
                pl.BlockSpec((4, tk, tn), lambda bi, ni, ki: (0, ki, ni)),  # w (streamed over K)
                pl.BlockSpec((4, tn), lambda bi, ni, ki: (0, ni)),          # fused bias
                pl.BlockSpec((tb, tn), lambda bi, ni, ki: (bi, ni)),        # cx
            ],
            out_specs=(
                pl.BlockSpec((tb, tn), lambda bi, ni, ki: (bi, ni)),        # hy
                pl.BlockSpec((tb, tn), lambda bi, ni, ki: (bi, ni)),        # cy
            ),
            scratch_shapes=[pltpu.VMEM((4, tb, tn), jnp.float32)],          # gate accumulator
        ),
        compiler_params=pltpu.CompilerParams(
            dimension_semantics=("parallel", "parallel", "arbitrary"),
            vmem_limit_bytes=32 * 1024 * 1024,
        ),
    )(xz, nz, w, b, cx)
    return hy, cy


def _reference(x, hx, cx, w_ih, w_hh, b_ih, b_hh, noise_in, noise_hidden):
    # Pure-JAX f32 reference of the module's math.
    xg = x[None] * noise_in                                  # (4, B, I)
    hg = hx[None] * noise_hidden                             # (4, B, H)
    gates = (jnp.einsum('gbi,gih->gbh', xg, w_ih) + b_ih[:, None, :]
             + jnp.einsum('gbh,ghk->gbk', hg, w_hh) + b_hh[:, None, :])
    i, f, c, o = gates
    cy = jax.nn.sigmoid(f) * cx + jax.nn.sigmoid(i) * jnp.tanh(c)
    hy = jax.nn.sigmoid(o) * jnp.tanh(cy)
    return hy, cy


if __name__ == "__main__":
    # Small deterministic shapes consistent with the module.
    batch, input_size, hidden_size = 8, 32, 32
    p_in, p_hidden = 0.5, 0.5

    key = jax.random.PRNGKey(0)
    kx, kh, kc, kwi, kwh, kni, knh = jax.random.split(key, 7)

    stdv = 1.0 / (hidden_size ** 0.5)
    # reset_parameters(): 3-D weights ~ U(-stdv, stdv); 2-D biases = 0.
    weight_ih = jax.random.uniform(kwi, (4, input_size, hidden_size),
                                   minval=-stdv, maxval=stdv, dtype=jnp.float32)
    weight_hh = jax.random.uniform(kwh, (4, hidden_size, hidden_size),
                                   minval=-stdv, maxval=stdv, dtype=jnp.float32)
    bias_ih = jnp.zeros((4, hidden_size), jnp.float32)
    bias_hh = jnp.zeros((4, hidden_size), jnp.float32)

    # reset_noise(batch_size) in training mode: bernoulli(1-p) / (1-p).
    noise_in = (jax.random.bernoulli(kni, 1.0 - p_in, (4, batch, input_size))
                .astype(jnp.float32) / (1.0 - p_in))
    noise_hidden = (jax.random.bernoulli(knh, 1.0 - p_hidden, (4, batch, hidden_size))
                    .astype(jnp.float32) / (1.0 - p_hidden))

    x = jax.random.normal(kx, (batch, input_size), jnp.float32)
    hx = jax.random.normal(kh, (batch, hidden_size), jnp.float32)
    cx = jax.random.normal(kc, (batch, hidden_size), jnp.float32)

    hy_ref, cy_ref = _reference(x, hx, cx, weight_ih, weight_hh,
                                bias_ih, bias_hh, noise_in, noise_hidden)

    # Exact f32 path (matches the PyTorch module's arithmetic).
    hy, cy = var_lstm_cell(x, hx, cx, weight_ih, weight_hh, bias_ih, bias_hh,
                           noise_in, noise_hidden, compute_dtype=jnp.float32)
    jax.block_until_ready((hy, cy))
    assert jnp.allclose(hy, hy_ref, atol=1e-5, rtol=1e-5)
    assert jnp.allclose(cy, cy_ref, atol=1e-5, rtol=1e-5)

    # Fast bf16-weights path (halves weight HBM traffic; f32 accumulation + f32 epilogue).
    hy_bf, cy_bf = var_lstm_cell(x, hx, cx, weight_ih, weight_hh, bias_ih, bias_hh,
                                 noise_in, noise_hidden, compute_dtype=jnp.bfloat16)
    jax.block_until_ready((hy_bf, cy_bf))
    assert float(jnp.max(jnp.abs(hy_bf - hy_ref))) < 0.1
    assert float(jnp.max(jnp.abs(cy_bf - cy_ref))) < 0.1

    print("KERNEL_OK")
</pallas_src>

<mosaic_0001>
module attributes {stable_mosaic.version = 11 : i64} {
  func.func @_var_lstm_cell_kernel(%arg0: i32, %arg1: i32, %arg2: i32, %arg3: memref<8x64xf32, #tpu.memory_space<vmem>>, %arg4: memref<4x8x64xf32, #tpu.memory_space<vmem>>, %arg5: memref<4x64x32xf32, #tpu.memory_space<vmem>>, %arg6: memref<4x32xf32, #tpu.memory_space<vmem>>, %arg7: memref<8x32xf32, #tpu.memory_space<vmem>>, %arg8: memref<8x32xf32, #tpu.memory_space<vmem>>, %arg9: memref<8x32xf32, #tpu.memory_space<vmem>>, %arg10: memref<4x8x32xf32, #tpu.memory_space<vmem>>) attributes {dimension_semantics = [#tpu.dimension_semantics<parallel>, #tpu.dimension_semantics<parallel>, #tpu.dimension_semantics<arbitrary>], iteration_bounds = array<i64: 1, 1, 1>, scalar_prefetch = 0 : i64, scratch_operands = 1 : i64, tpu.core_type = #tpu.core_type<tc>, window_params = [{transform_indices = @transform_0, window_bounds = array<i64: 8, 64>}, {transform_indices = @transform_1, window_bounds = array<i64: 4, 8, 64>}, {transform_indices = @transform_2, window_bounds = array<i64: 4, 64, 32>}, {transform_indices = @transform_3, window_bounds = array<i64: 4, 32>}, {transform_indices = @transform_4, window_bounds = array<i64: 8, 32>}, {transform_indices = @transform_5, window_bounds = array<i64: 8, 32>}, {transform_indices = @transform_6, window_bounds = array<i64: 8, 32>}]} {
    %c0_i32 = arith.constant 0 : i32
    %0 = arith.cmpi eq, %arg2, %c0_i32 : i32
    %1 = arith.extui %0 : i1 to i32
    %c0_i32_0 = arith.constant 0 : i32
    %2 = arith.cmpi ne, %1, %c0_i32_0 : i32
    scf.if %2 {
      %cst_16 = arith.constant 0.000000e+00 : f32
      %16 = vector.broadcast %cst_16 : f32 to vector<4x8x32xf32>
      %c0_17 = arith.constant 0 : index
      %c0_18 = arith.constant 0 : index
      %c0_19 = arith.constant 0 : index
      %17 = vector.load %arg10[%c0_17, %c0_18, %c0_19] : memref<4x8x32xf32, #tpu.memory_space<vmem>>, vector<4x8x32xf32>
      tpu.vector_store %arg10[%c0_17, %c0_18, %c0_19], %16 {strides = array<i32>} : memref<4x8x32xf32, #tpu.memory_space<vmem>>, vector<4x8x32xf32>,
    } else {
    }
    %c0 = arith.constant 0 : index
    %c0_1 = arith.constant 0 : index
    %3 = vector.load %arg3[%c0, %c0_1] : memref<8x64xf32, #tpu.memory_space<vmem>>, vector<8x64xf32>
    %4 = vector.shape_cast %3 : vector<8x64xf32> to vector<1x8x64xf32>
    %c0_2 = arith.constant 0 : index
    %c0_3 = arith.constant 0 : index
    %c0_4 = arith.constant 0 : index
    %5 = vector.load %arg4[%c0_2, %c0_3, %c0_4] : memref<4x8x64xf32, #tpu.memory_space<vmem>>, vector<4x8x64xf32>
    %6 = vector.broadcast %4 : vector<1x8x64xf32> to vector<4x8x64xf32>
    %7 = arith.mulf %6, %5 : vector<4x8x64xf32>
    %c0_5 = arith.constant 0 : index
    %c0_6 = arith.constant 0 : index
    %c0_7 = arith.constant 0 : index
    %8 = vector.load %arg5[%c0_5, %c0_6, %c0_7] : memref<4x64x32xf32, #tpu.memory_space<vmem>>, vector<4x64x32xf32>
    %c0_8 = arith.constant 0 : index
    %c0_9 = arith.constant 0 : index
    %c0_10 = arith.constant 0 : index
    %9 = vector.load %arg10[%c0_8, %c0_9, %c0_10] : memref<4x8x32xf32, #tpu.memory_space<vmem>>, vector<4x8x32xf32>
    %cst = arith.constant dense<0.000000e+00> : vector<4x8x32xf32>
    %10 = tpu.matmul %7, %8, %cst {dimension_numbers = #tpu.dot_dimension_numbers<[2], [1], [1], [2], [0, 0, 0, 1, 1, 2], [0], [0]>} : vector<4x8x64xf32>, vector<4x64x32xf32>, vector<4x8x32xf32> -> vector<4x8x32xf32>
    %11 = arith.addf %9, %10 : vector<4x8x32xf32>
    %c0_11 = arith.constant 0 : index
    %c0_12 = arith.constant 0 : index
    %c0_13 = arith.constant 0 : index
    %12 = vector.load %arg10[%c0_11, %c0_12, %c0_13] : memref<4x8x32xf32, #tpu.memory_space<vmem>>, vector<4x8x32xf32>
    tpu.vector_store %arg10[%c0_11, %c0_12, %c0_13], %11 {strides = array<i32>} : memref<4x8x32xf32, #tpu.memory_space<vmem>>, vector<4x8x32xf32>,
    %c0_i32_14 = arith.constant 0 : i32
    %13 = arith.cmpi eq, %arg2, %c0_i32_14 : i32
    %14 = arith.extui %13 : i1 to i32
    %c0_i32_15 = arith.constant 0 : i32
    %15 = arith.cmpi ne, %14, %c0_i32_15 : i32
    scf.if %15 {
      %c0_16 = arith.constant 0 : index
      %c0_17 = arith.constant 0 : index
      %16 = vector.load %arg6[%c0_16, %c0_17] : memref<4x32xf32, #tpu.memory_space<vmem>>, vector<4x32xf32>
      %c0_18 = arith.constant 0 : index
      %c0_19 = arith.constant 0 : index
      %c0_20 = arith.constant 0 : index
      %17 = vector.load %arg10[%c0_18, %c0_19, %c0_20] : memref<4x8x32xf32, #tpu.memory_space<vmem>>, vector<1x8x32xf32>
      %18 = vector.shape_cast %17 : vector<1x8x32xf32> to vector<8x32xf32>
      %19 = vector.extract_strided_slice %16 {offsets = [0, 0], sizes = [1, 32], strides = [1, 1]} : vector<4x32xf32> to vector<1x32xf32>
      %20 = vector.broadcast %19 : vector<1x32xf32> to vector<8x32xf32>
      %21 = arith.addf %18, %20 : vector<8x32xf32>
      %22 = arith.negf %21 : vector<8x32xf32>
      %23 = math.exp %22 : vector<8x32xf32>
      %cst_21 = arith.constant 1.000000e+00 : f32
      %24 = vector.broadcast %cst_21 : f32 to vector<8x32xf32>
      %25 = arith.addf %24, %23 : vector<8x32xf32>
      %26 = arith.divf %24, %25 : vector<8x32xf32>
      %c2 = arith.constant 2 : index
      %c0_22 = arith.constant 0 : index
      %c0_23 = arith.constant 0 : index
      %27 = vector.load %arg10[%c2, %c0_22, %c0_23] : memref<4x8x32xf32, #tpu.memory_space<vmem>>, vector<1x8x32xf32>
      %28 = vector.shape_cast %27 : vector<1x8x32xf32> to vector<8x32xf32>
      %29 = vector.extract_strided_slice %16 {offsets = [2, 0], sizes = [1, 32], strides = [1, 1]} : vector<4x32xf32> to vector<1x32xf32>
      %30 = vector.broadcast %29 : vector<1x32xf32> to vector<8x32xf32>
      %31 = arith.addf %28, %30 : vector<8x32xf32>
      %32 = math.tanh %31 : vector<8x32xf32>
      %33 = arith.mulf %26, %32 : vector<8x32xf32>
      %c1 = arith.constant 1 : index
      %c0_24 = arith.constant 0 : index
      %c0_25 = arith.constant 0 : index
      %34 = vector.load %arg10[%c1, %c0_24, %c0_25] : memref<4x8x32xf32, #tpu.memory_space<vmem>>, vector<1x8x32xf32>
      %35 = vector.shape_cast %34 : vector<1x8x32xf32> to vector<8x32xf32>
      %36 = vector.extract_strided_slice %16 {offsets = [1, 0], sizes = [1, 32], strides = [1, 1]} : vector<4x32xf32> to vector<1x32xf32>
      %37 = vector.broadcast %36 : vector<1x32xf32> to vector<8x32xf32>
      %38 = arith.addf %35, %37 : vector<8x32xf32>
      %39 = arith.negf %38 : vector<8x32xf32>
      %40 = math.exp %39 : vector<8x32xf32>
      %cst_26 = arith.constant 1.000000e+00 : f32
      %41 = vector.broadcast %cst_26 : f32 to vector<8x32xf32>
      %42 = arith.addf %41, %40 : vector<8x32xf32>
      %43 = arith.divf %41, %42 : vector<8x32xf32>
      %c0_27 = arith.constant 0 : index
      %c0_28 = arith.constant 0 : index
      %44 = vector.load %arg7[%c0_27, %c0_28] : memref<8x32xf32, #tpu.memory_space<vmem>>, vector<8x32xf32>
      %45 = arith.mulf %43, %44 : vector<8x32xf32>
      %46 = arith.addf %45, %33 : vector<8x32xf32>
      %c3 = arith.constant 3 : index
      %c0_29 = arith.constant 0 : index
      %c0_30 = arith.constant 0 : index
      %47 = vector.load %arg10[%c3, %c0_29, %c0_30] : memref<4x8x32xf32, #tpu.memory_space<vmem>>, vector<1x8x32xf32>
      %48 = vector.shape_cast %47 : vector<1x8x32xf32> to vector<8x32xf32>
      %49 = vector.extract_strided_slice %16 {offsets = [3, 0], sizes = [1, 32], strides = [1, 1]} : vector<4x32xf32> to vector<1x32xf32>
      %50 = vector.broadcast %49 : vector<1x32xf32> to vector<8x32xf32>
      %51 = arith.addf %48, %50 : vector<8x32xf32>
      %52 = arith.negf %51 : vector<8x32xf32>
      %53 = math.exp %52 : vector<8x32xf32>
      %cst_31 = arith.constant 1.000000e+00 : f32
      %54 = vector.broadcast %cst_31 : f32 to vector<8x32xf32>
      %55 = arith.addf %54, %53 : vector<8x32xf32>
      %56 = arith.divf %54, %55 : vector<8x32xf32>
      %57 = math.tanh %46 : vector<8x32xf32>
      %58 = arith.mulf %56, %57 : vector<8x32xf32>
      %c0_32 = arith.constant 0 : index
      %c0_33 = arith.constant 0 : index
      %59 = vector.load %arg9[%c0_32, %c0_33] : memref<8x32xf32, #tpu.memory_space<vmem>>, vector<8x32xf32>
      tpu.vector_store %arg9[%c0_32, %c0_33], %46 {strides = array<i32>} : memref<8x32xf32, #tpu.memory_space<vmem>>, vector<8x32xf32>,
      %c0_34 = arith.constant 0 : index
      %c0_35 = arith.constant 0 : index
      %60 = vector.load %arg8[%c0_34, %c0_35] : memref<8x32xf32, #tpu.memory_space<vmem>>, vector<8x32xf32>
      tpu.vector_store %arg8[%c0_34, %c0_35], %58 {strides = array<i32>} : memref<8x32xf32, #tpu.memory_space<vmem>>, vector<8x32xf32>,
    } else {
    }
    return
  }
  func.func @transform_0(%arg0: i32, %arg1: i32, %arg2: i32) -> (i32, i32) {
    %c0_i32 = arith.constant 0 : i32
    return %arg0, %arg2 : i32, i32
  }
  func.func @transform_1(%arg0: i32, %arg1: i32, %arg2: i32) -> (i32, i32, i32) {
    %c0_i32 = arith.constant 0 : i32
    %c0_i32_0 = arith.constant 0 : i32
    return %c0_i32, %arg0, %arg2 : i32, i32, i32
  }
  func.func @transform_2(%arg0: i32, %arg1: i32, %arg2: i32) -> (i32, i32, i32) {
    %c0_i32 = arith.constant 0 : i32
    %c0_i32_0 = arith.constant 0 : i32
    return %c0_i32, %arg2, %arg1 : i32, i32, i32
  }
  func.func @transform_3(%arg0: i32, %arg1: i32, %arg2: i32) -> (i32, i32) {
    %c0_i32 = arith.constant 0 : i32
    %c0_i32_0 = arith.constant 0 : i32
    return %c0_i32, %arg1 : i32, i32
  }
  func.func @transform_4(%arg0: i32, %arg1: i32, %arg2: i32) -> (i32, i32) {
    %c0_i32 = arith.constant 0 : i32
    return %arg0, %arg1 : i32, i32
  }
  func.func @transform_5(%arg0: i32, %arg1: i32, %arg2: i32) -> (i32, i32) {
    %c0_i32 = arith.constant 0 : i32
    return %arg0, %arg1 : i32, i32
  }
  func.func @transform_6(%arg0: i32, %arg1: i32, %arg2: i32) -> (i32, i32) {
    %c0_i32 = arith.constant 0 : i32
    return %arg0, %arg1 : i32, i32
  }
}

</mosaic_0001>

<bundles_post_ra>
// kernel: tpu_custom_call.1
= control target key start
LH: loop header
LB: loop body
LE: loop exit
PB: predicated region body
PF: predicated region fallthrough
CT: control target
= control target key end

     0   :  { %12 = vsyncpa [#allocation4], 0  ;;  %v649_v2 = vmov 0.0   ;;  %vm28_vm0 = vcmask 261120   ;;  %s875_s0 = inlined_call_operand.vmem [shape: f32[8,64], index: 0, kind: input, shape index: {}]   ;;  %s876_s1 = inlined_call_operand.vmem [shape: f32[4,8,64], index: 1, kind: input, shape index: {}]   ;;  %s877_s2 = inlined_call_operand.vmem [shape: f32[4,64,32], index: 2, kind: input, shape index: {}]   ;;  %s878_s3 = inlined_call_operand.vmem [shape: f32[4,32], index: 3, kind: input, shape index: {}]   ;;  %s879_s4 = inlined_call_operand.vmem [shape: f32[8,32], index: 4, kind: input, shape index: {}]   ;;  %s880_s5 = inlined_call_operand.hbm [shape: f32[8,32], index: 5, kind: output, shape index: {0}]   ;;  %s881_s6 = inlined_call_operand.hbm [shape: f32[8,32], index: 6, kind: output, shape index: {1}]  }
   0x1   :  { %v49_v0 = vld [vmem:[%s877_s2 + $0x38] sm:$0xff]  ;;  %509 = vmatprep.subr.mxu0 %v649_v2  ;;  %528 = vmatprep.subr.mxu1 %v649_v2  ;;  %v48_v3 = vld [vmem:[%s877_s2 + $0x30] sm:$0xff]  ;;  %29 = vst.msk [vmem:[#allocation2] sm:$0xff] %vm28_vm0, %v649_v2  ;;  %30 = vst.msk [vmem:[#allocation2 + $0x8] sm:$0xff] %vm28_vm0, %v649_v2 }
   0x2   :  { %v57_v1 = vld [vmem:[%s877_s2 + $0x78] sm:$0xff]  ;;  %v56_v4 = vld [vmem:[%s877_s2 + $0x70] sm:$0xff]  ;;  %510 = vmatpush3.msra.mxu0 %v49_v0  ;;  %31 = vst.msk [vmem:[#allocation2 + $0x10] sm:$0xff] %vm28_vm0, %v649_v2  ;;  %32 = vst.msk [vmem:[#allocation2 + $0x18] sm:$0xff] %vm28_vm0, %v649_v2 }
   0x3   :  { %529 = vmatpush3.msra.mxu1 %v57_v1  ;;  %511 = vmatprep.subr.mxu0 %v649_v2  ;;  %v47_v5 = vld [vmem:[%s877_s2 + $0x28] sm:$0xff]  ;;  %v46_v7 = vld [vmem:[%s877_s2 + $0x20] sm:$0xff]  ;;  %v45_v9 = vld [vmem:[%s877_s2 + $0x18] sm:$0xff] }
   0x4   :  { %530 = vmatprep.subr.mxu1 %v649_v2  ;;  %v55_v6 = vld [vmem:[%s877_s2 + $0x68] sm:$0xff]  ;;  %512 = vmatpush3.msra.mxu0 %v48_v3  ;;  %v54_v8 = vld [vmem:[%s877_s2 + $0x60] sm:$0xff]  ;;  %v53_v10 = vld [vmem:[%s877_s2 + $0x58] sm:$0xff] }
   0x5   :  { %531 = vmatpush3.msra.mxu1 %v56_v4  ;;  %513 = vmatprep.subr.mxu0 %v649_v2  ;;  %v44_v11 = vld [vmem:[%s877_s2 + $0x10] sm:$0xff]  ;;  %v43_v13 = vld [vmem:[%s877_s2 + $0x8] sm:$0xff]  ;;  %v753_v15 = vld [vmem:[%s875_s0] sm:$0xff] }
   0x6   :  { %532 = vmatprep.subr.mxu1 %v649_v2  ;;  %514 = vmatpush3.msra.mxu0 %v47_v5  ;;  %v52_v12 = vld [vmem:[%s877_s2 + $0x50] sm:$0xff]  ;;  %v51_v14 = vld [vmem:[%s877_s2 + $0x48] sm:$0xff]  ;;  %v34_v16 = vld [vmem:[%s876_s1] sm:$0xff] }
   0x7   :  { %533 = vmatpush3.msra.mxu1 %v55_v6  ;;  %515 = vmatprep.subr.mxu0 %v649_v2  ;;  %v35_v17 = vld [vmem:[%s876_s1 + $0x8] sm:$0xff] }
   0x8   :  { %534 = vmatprep.subr.mxu1 %v649_v2  ;;  %516 = vmatpush3.msra.mxu0 %v46_v7 }
   0x9   :  { %535 = vmatpush3.msra.mxu1 %v54_v8  ;;  %517 = vmatprep.subr.mxu0 %v649_v2 }
   0xa   :  { %536 = vmatprep.subr.mxu1 %v649_v2  ;;  %518 = vmatpush3.msra.mxu0 %v45_v9 }
   0xb   :  { %537 = vmatpush3.msra.mxu1 %v53_v10  ;;  %519 = vmatprep.subr.mxu0 %v649_v2 }
   0xc   :  { %538 = vmatprep.subr.mxu1 %v649_v2  ;;  %520 = vmatpush3.msra.mxu0 %v44_v11 }
   0xd   :  { %539 = vmatpush3.msra.mxu1 %v52_v12 }
   0xe   :  { %13 = vsyncpa [#allocation6], 0  ;;  %521 = vmatprep.subr.mxu0 %v649_v2  ;;  %540 = vmatprep.subr.mxu1 %v649_v2  ;;  %v42_v18 = vld [vmem:[%s877_s2] sm:$0xff]  ;;  %v38_v20 = vmul.f32 %v34_v16, %v753_v15  ;;  %v39_v21 = vmul.f32 %v35_v17, %v753_v15  ;;  %vm78_vm1 = vcmask 523264   ;;  %vm650_vm2 = vmmov 0   ;;  %v65_v22 = vld [vmem:[%s877_s2 + $0xb8] sm:$0xff] }
   0xf   :  { %522 = vmatpush3.msra.mxu0 %v43_v13  ;;  %541 = vmatpush3.msra.mxu1 %v51_v14  ;;  %v50_v19 = vld [vmem:[%s877_s2 + $0x40] sm:$0xff]  ;;  %v73_v23 = vld [vmem:[%s877_s2 + $0xf8] sm:$0xff]  ;;  %v64_v24 = vld [vmem:[%s877_s2 + $0xb0] sm:$0xff]  ;;  %v385_v42 = vlaneseq  ;;  %s651_s22 = smov [#allocation5]  }
  0x10   :  { %523 = vmatprep.subr.mxu0 %v649_v2  ;;  %542 = vmatprep.subr.mxu1 %v649_v2  ;;  %v72_v25 = vld [vmem:[%s877_s2 + $0xf0] sm:$0xff]  ;;  %v63_v26 = vld [vmem:[%s877_s2 + $0xa8] sm:$0xff]  ;;  %v62_v28 = vld [vmem:[%s877_s2 + $0xa0] sm:$0xff]  ;;  %s454_s23 = sshll.u32 %s651_s22, 4  ;;  %s455_s23 = int_to_ptr.vmem [resolvable:$true] %s454_s23 }
  0x11   :  { %524 = vmatpush3.msra.mxu0 %v42_v18  ;;  %525 = vmatprep.mubr.msk.f32.mxu0 %vm650_vm2, %v649_v2  ;;  %v71_v27 = vld [vmem:[%s877_s2 + $0xe8] sm:$0xff]  ;;  %v70_v29 = vld [vmem:[%s877_s2 + $0xe0] sm:$0xff]  ;;  %v61_v30 = vld [vmem:[%s877_s2 + $0x98] sm:$0xff]  ;;  %v386_v45 = vshrl.u32 %v385_v42, 7  ;;  %s605_s24 = scalar_lea.vmem %s455_s23, 128  ;;  %p610_p1 = scmp.lt.s32.totalorder %s455_s23, %s455_s23 }
  0x12   :  { %543 = vmatpush3.msra.mxu1 %v50_v19  ;;  %544 = vmatprep.mubr.msk.f32.mxu1 %vm650_vm2, %v649_v2  ;;  %v69_v31 = vld [vmem:[%s877_s2 + $0xd8] sm:$0xff]  ;;  %v60_v32 = vld [vmem:[%s877_s2 + $0x90] sm:$0xff]  ;;  %v59_v34 = vld [vmem:[%s877_s2 + $0x88] sm:$0xff]  ;;  %p606_p0 = scmp.ne.s32.totalorder %s455_s23, %s605_s24  ;;  %p611_p2 = scmp.lt.s32.totalorder %s605_s24, %s605_s24 }
  0x13   :  { %526 = vmatmul.mubr.msk.f32.vlgmr.msra.gmra.mxu0 %vm78_vm1, %v38_v20  ;;  %545 = vmatmul.mubr.msk.f32.vlgmr.msra.gmra.mxu1 %vm78_vm1, %v39_v21  ;;  %v68_v33 = vld [vmem:[%s877_s2 + $0xd0] sm:$0xff]  ;;  %v67_v35 = vld [vmem:[%s877_s2 + $0xc8] sm:$0xff]  ;;  %v37_v37 = vld [vmem:[%s876_s1 + $0x18] sm:$0xff]  ;;  %v387_v52 = vsub.s32 0, %v386_v45  ;;  %v409_v53 = vsub.s32 1, %v386_v45  ;;  %v400_v7 = vsub.s32 2, %v386_v45 }
  0x14   :  { %547 = vmatprep.subr.mxu0 %v649_v2  ;;  %566 = vmatprep.subr.mxu1 %v649_v2  ;;  %v36_v36 = vld [vmem:[%s876_s1 + $0x10] sm:$0xff]  ;;  %v58_v38 = vld [vmem:[%s877_s2 + $0x80] sm:$0xff]  ;;  %v41_v41 = vmul.f32 %v37_v37, %v753_v15  ;;  %v75_v44 = vld [vmem:[#allocation2 + $0x8] sm:$0xff]  ;;  %v425_v8 = vsub.s32 3, %v386_v45  ;;  %p612_p3 = por %p611_p2, %p610_p1 }
  0x15   :  { %548 = vmatpush3.msra.mxu0 %v65_v22  ;;  %567 = vmatpush3.msra.mxu1 %v73_v23  ;;  %v66_v39 = vld [vmem:[%s877_s2 + $0xc0] sm:$0xff]  ;;  %v40_v40 = vmul.f32 %v36_v36, %v753_v15  ;;  %v76_v63 = vld [vmem:[#allocation2 + $0x10] sm:$0xff]  ;;  %v77_v0 = vld [vmem:[#allocation2 + $0x18] sm:$0xff] }
  0x16   :  { %549 = vmatprep.subr.mxu0 %v649_v2  ;;  %568 = vmatprep.subr.mxu1 %v649_v2  ;;  %v74_v43 = vld [vmem:[#allocation2] sm:$0xff]  ;;  %p613_p4 = pnand %p612_p3, %p606_p0 }
  0x17   :  { %550 = vmatpush3.msra.mxu0 %v64_v24  ;;  %569 = vmatpush3.msra.mxu1 %v72_v25  ;;  %v383_v54 = vld [vmem:[%s878_s3] sm:$0xf] }
  0x18   :  { %551 = vmatprep.subr.mxu0 %v649_v2  ;;  %570 = vmatprep.subr.mxu1 %v649_v2  ;;  %v388_v55 = vrot.slane %v383_v54, %v387_v52  ;;  %v410_v56 = vrot.slane %v383_v54, %v409_v53  ;;  %v401_v9 = vrot.slane %v383_v54, %v400_v7  ;;  %v418_v21 = vld [vmem:[%s879_s4] sm:$0xff] }
  0x19   :  { %552 = vmatpush3.msra.mxu0 %v63_v26  ;;  %571 = vmatpush3.msra.mxu1 %v71_v27  ;;  %v426_v10 = vrot.slane %v383_v54, %v425_v8 }
  0x1a   :  { %553 = vmatprep.subr.mxu0 %v649_v2  ;;  %572 = vmatprep.subr.mxu1 %v649_v2 }
  0x1b   :  { %554 = vmatpush3.msra.mxu0 %v62_v28  ;;  %573 = vmatpush3.msra.mxu1 %v70_v29 }
  0x1c   :  { %555 = vmatprep.subr.mxu0 %v649_v2  ;;  %574 = vmatprep.subr.mxu1 %v649_v2 }
  0x1d   :  { %556 = vmatpush3.msra.mxu0 %v61_v30  ;;  %575 = vmatpush3.msra.mxu1 %v69_v31 }
  0x1e   :  { %557 = vmatprep.subr.mxu0 %v649_v2  ;;  %576 = vmatprep.subr.mxu1 %v649_v2 }
  0x1f   :  { %558 = vmatpush3.msra.mxu0 %v60_v32  ;;  %577 = vmatpush3.msra.mxu1 %v68_v33 }
  0x20   :  { %559 = vmatprep.subr.mxu0 %v649_v2  ;;  %578 = vmatprep.subr.mxu1 %v649_v2 }
  0x21   :  { %560 = vmatpush3.msra.mxu0 %v59_v34  ;;  %579 = vmatpush3.msra.mxu1 %v67_v35 }
  0x22   :  { %561 = vmatprep.subr.mxu0 %v649_v2  ;;  %580 = vmatprep.subr.mxu1 %v649_v2 }
  0x23   :  { %562 = vmatpush3.msra.mxu0 %v58_v38  ;;  %563 = vmatprep.mubr.msk.f32.mxu0 %vm650_vm2, %v649_v2 }
  0x24   :  { %581 = vmatpush3.msra.mxu1 %v66_v39  ;;  %582 = vmatprep.mubr.msk.f32.mxu1 %vm650_vm2, %v649_v2 }
  0x25   :  { %564 = vmatmul.mubr.msk.f32.vlgmr.msra.gmra.mxu0 %vm78_vm1, %v40_v40  ;;  %583 = vmatmul.mubr.msk.f32.vlgmr.msra.gmra.mxu1 %vm78_vm1, %v41_v41 }
  0xd3   :  { %v148_v46 = vpop.f32.mrf.mxu0  ;;  %v221_v47 = vpop.f32.mrf.mxu1 }
  0xd4   :  { %v371_v48 = vadd.f32 %v148_v46, %v74_v43  ;;  %v372_v49 = vadd.f32 %v221_v47, %v75_v44 }
  0xd5   :  { %v527_v50 = vpop.f32.mrf.mxu0  ;;  %v546_v51 = vpop.f32.mrf.mxu1 }
  0xd6   :  { %376 = vst.msk [vmem:[#allocation2] sm:$0xff] %vm28_vm0, %v371_v48  ;;  %377 = vst.msk [vmem:[#allocation2 + $0x8] sm:$0xff] %vm28_vm0, %v372_v49 }
  0xdd   :  { %v384_v57 = vld [vmem:[#allocation2] sm:$0xff]  ;;  %v406_v58 = vld [vmem:[#allocation2 + $0x8] sm:$0xff] }
  0xde   :  { %v389_v59 = vadd.f32 %v388_v55, %v384_v57  ;;  %v411_v60 = vadd.f32 %v410_v56, %v406_v58 }
  0xe0   :  { %v470_v61 = vmul.f32 -1.442695, %v389_v59  ;;  %v471_v62 = vmul.f32 -1.442695, %v411_v60 }
  0xe2   :  { %589 = vpow2.f32 %v470_v61 }
  0xe3   :  { %591 = vpow2.f32 %v471_v62 }
  0xe5   :  { %v294_v1 = vpop.f32.mrf.mxu0  ;;  %v367_v2 = vpop.f32.mrf.mxu1 }
  0xe6   :  { %v373_v3 = vadd.f32 %v294_v1, %v76_v63  ;;  %v374_v4 = vadd.f32 %v367_v2, %v77_v0 }
  0xe7   :  { %v565_v5 = vpop.f32.mrf.mxu0  ;;  %v584_v6 = vpop.f32.mrf.mxu1 }
  0xe8   :  { %378 = vst.msk [vmem:[#allocation2 + $0x10] sm:$0xff] %vm28_vm0, %v373_v3  ;;  %379 = vst.msk [vmem:[#allocation2 + $0x18] sm:$0xff] %vm28_vm0, %v374_v4 }
  0xef   :  { %v590_v11 = vpop.eup %589  ;;  %v397_v12 = vld [vmem:[#allocation2 + $0x10] sm:$0xff]  ;;  %v422_v13 = vld [vmem:[#allocation2 + $0x18] sm:$0xff] }
  0xf0   :  { %v592_v14 = vpop.eup %591  ;;  %v393_v15 = vadd.f32 1.0, %v590_v11  ;;  %v402_v16 = vadd.f32 %v401_v9, %v397_v12  ;;  %v427_v17 = vadd.f32 %v426_v10, %v422_v13 }
  0xf1   :  { %v415_v18 = vadd.f32 1.0, %v592_v14 }
  0xf2   :  { %593 = vrcp.f32 %v393_v15  ;;  %v472_v19 = vmul.f32 -1.442695, %v427_v17 }
  0xf3   :  { %595 = vtanh.f32 %v402_v16 }
  0xf4   :  { %597 = vrcp.f32 %v415_v18 }
  0xf5   :  { %599 = vpow2.f32 %v472_v19 }
  0xff   :  { %v594_v20 = vpop.eup %593 }
 0x100   :  { %v596_v22 = vpop.eup %595 }
 0x101   :  { %v598_v23 = vpop.eup %597  ;;  %v404_v24 = vmul.f32 %v596_v22, %v594_v20 }
 0x102   :  { %v600_v25 = vpop.eup %599  ;;  %v419_v26 = vmul.f32 %v598_v23, %v418_v21 }
 0x103   :  { %v431_v27 = vadd.f32 1.0, %v600_v25 }
 0x104   :  { %v420_v28 = vadd.f32 %v419_v26, %v404_v24 }
 0x105   :  { %601 = vrcp.f32 %v431_v27 }
 0x106   :  { %603 = vtanh.f32 %v420_v28  ;;  %436 = vst.msk [vmem:[#allocation5] sm:$0xff] %vm28_vm0, %v420_v28 }
 0x107   :  { %616 = shalt.err (!%p613_p4)
}
 0x108   :  { %457 = dma.vmem_to_hbm [thread:$0]  %s455_s23, 128, %s881_s6, [#allocation6]  }
 0x109   :  { %s652_s26 = smov [#allocation3]  }
 0x10a   :  { %s444_s27 = sshll.u32 %s652_s26, 4  ;;  %s445_s27 = int_to_ptr.vmem [resolvable:$true] %s444_s27 }
 0x10b   :  { %s625_s28 = scalar_lea.vmem %s445_s27, 128  ;;  %p630_p6 = scmp.lt.s32.totalorder %s445_s27, %s445_s27 }
 0x10c   :  { %p626_p5 = scmp.ne.s32.totalorder %s445_s27, %s625_s28  ;;  %p631_p7 = scmp.lt.s32.totalorder %s625_s28, %s625_s28 }
 0x10e   :  { %p632_p8 = por %p631_p7, %p630_p6 }
 0x110   :  { %p633_p9 = pnand %p632_p8, %p626_p5 }
 0x112   :  { %v602_v29 = vpop.eup %601 }
 0x113   :  { %v604_v30 = vpop.eup %603 }
 0x114   :  { %v435_v31 = vmul.f32 %v604_v30, %v602_v29 }
 0x116   :  { %437 = vst.msk [vmem:[#allocation3] sm:$0xff] %vm28_vm0, %v435_v31 }
 0x117   :  { %636 = shalt.err (!%p633_p9)
}
 0x118   :  { %447 = dma.vmem_to_hbm [thread:$0]  %s445_s27, 128, %s880_s5, [#allocation4]  }
 0x119   :  { %645 = dma.done.wait [#allocation4], 128  }
 0x11a   :  { %646 = vsyncadd [#allocation4], 4294967168 }
 0x11b   :  { %647 = dma.done.wait [#allocation6], 128  }
 0x11c   :  { %648 = vsyncadd [#allocation6], 4294967168 }
 0x11d   :  { %464 = vsyncpa [#allocation4], 1 }
 0x11e   :  { %465 = vsyncpa [#allocation6], 1 }

</bundles_post_ra>
